<compile_context>
chip_gen: v7x
topology: tpu7x:2x2x1
jax: 0.10.0
libtpu: 0.0.40
codegen_flags: <defaults>
</compile_context>

<pallas_src>
import functools
import math

import jax
import jax.numpy as jnp
from jax import lax
from jax.experimental import pallas as pl
from jax.experimental.pallas import tpu as pltpu


def attn_block_kernel(x_ref, gamma_ref, beta_ref, gmask_ref,
                      wqkv_ref, bqkv_ref, w3_ref, b3_ref,
                      y_ref, *scratch,
                      eps, n_group_elems, channels, kv_tile):
    x = x_ref[0]                                     # (N, C) f32
    N = x.shape[0]
    C = channels

    # ---- GroupNorm (two-pass, f32). Group membership is a one-hot (C, G)
    # matrix so per-group reduce / scatter-back are tiny MXU matmuls.
    gmask = gmask_ref[...]                           # (C, G)
    inv_n = 1.0 / n_group_elems
    ch_sum = jnp.sum(x, axis=0, keepdims=True)       # (1, C)
    grp_sum = jnp.dot(ch_sum, gmask, preferred_element_type=jnp.float32)   # (1, G)
    mean_g = grp_sum * inv_n
    mean_c = lax.dot_general(mean_g, gmask, (((1,), (1,)), ((), ())),
                             preferred_element_type=jnp.float32)           # (1, C)
    xc = x - mean_c                                  # centered (two-pass variance)
    ch_sq = jnp.sum(xc * xc, axis=0, keepdims=True)  # (1, C)
    grp_sq = jnp.dot(ch_sq, gmask, preferred_element_type=jnp.float32)     # (1, G)
    inv_g = lax.rsqrt(grp_sq * inv_n + eps)
    inv_c = lax.dot_general(inv_g, gmask, (((1,), (1,)), ((), ())),
                            preferred_element_type=jnp.float32)            # (1, C)
    scale_c = inv_c * gamma_ref[...]                 # fold affine -> one mul+add
    h = xc * scale_c + beta_ref[...]                 # (N, C) f32

    # ---- fused q/k/v projection: one (N,C)x(C,3C) bf16 matmul, f32 accumulate.
    qkv = jnp.dot(h.astype(jnp.bfloat16), wqkv_ref[...],
                  preferred_element_type=jnp.float32) + bqkv_ref[...]      # (N, 3C)
    q = qkv[:, :C].astype(jnp.bfloat16)              # 1/sqrt(C) already in Wq/bq
    k = qkv[:, C:2 * C].astype(jnp.bfloat16)
    v = qkv[:, 2 * C:].astype(jnp.bfloat16)

    # ---- attention with online softmax over KV tiles (flash-style).
    num_kv = N // kv_tile
    if num_kv == 1:
        s = lax.dot_general(q, k, (((1,), (1,)), ((), ())),
                            preferred_element_type=jnp.float32)            # (N, N)
        m = jnp.max(s, axis=-1, keepdims=True)
        p = jnp.exp(s - m)
        l = jnp.sum(p, axis=-1, keepdims=True)
        acc = jnp.dot(p.astype(jnp.bfloat16), v,
                      preferred_element_type=jnp.float32)                  # (N, C)
    else:
        k_scr, v_scr = scratch                       # bf16 scratch (half VMEM)
        k_scr[...] = k
        v_scr[...] = v

        def kv_step(t, carry):
            m, l, acc = carry
            start = pl.multiple_of(t * kv_tile, kv_tile)
            kt = k_scr[pl.ds(start, kv_tile), :]     # (TK, C) bf16, no cast here
            vt = v_scr[pl.ds(start, kv_tile), :]
            s = lax.dot_general(q, kt, (((1,), (1,)), ((), ())),
                                preferred_element_type=jnp.float32)        # (N, TK)
            m_new = jnp.maximum(m, jnp.max(s, axis=-1, keepdims=True))
            alpha = jnp.exp(m - m_new)
            p = jnp.exp(s - m_new)
            l_new = alpha * l + jnp.sum(p, axis=-1, keepdims=True)
            acc_new = alpha * acc + jnp.dot(p.astype(jnp.bfloat16), vt,
                                            preferred_element_type=jnp.float32)
            return m_new, l_new, acc_new

        m0 = jnp.full((N, 1), -jnp.inf, dtype=jnp.float32)
        l0 = jnp.zeros((N, 1), jnp.float32)
        acc0 = jnp.zeros((N, C), jnp.float32)
        m, l, acc = lax.fori_loop(0, num_kv, kv_step, (m0, l0, acc0),
                                  unroll=(num_kv <= 8))

    # deferred softmax normalization on the (N, C) output (EUP reciprocal),
    # instead of dividing the (N, N) probability matrix.
    o = acc * pl.reciprocal(l, approx=True)

    # ---- output NiN + skip-rescale.
    h2 = jnp.dot(o.astype(jnp.bfloat16), w3_ref[...],
                 preferred_element_type=jnp.float32) + b3_ref[...]
    y_ref[0] = (x + h2) * (1.0 / math.sqrt(2.0))


def attn_block(x_nchw, params, kv_tile=None):
    """AttnBlock forward. x_nchw: (B, C, H, W) float32 -> (B, C, H, W)."""
    B, C, H, W = x_nchw.shape
    N = H * W
    G = min(C // 4, 32)
    assert C % G == 0, "channels must be divisible by the GroupNorm group count"
    Cg = C // G

    if kv_tile is None:
        kv_tile = N if N <= 512 else next(
            (t for t in (512, 256, 128) if N % t == 0), N)
    assert N % kv_tile == 0 and kv_tile % 8 == 0
    num_kv = N // kv_tile

    # NOTE: these two transposes cost extra HBM round trips; keep activations
    # channels-last end-to-end in the surrounding model to remove them.
    x_bnc = jnp.transpose(x_nchw, (0, 2, 3, 1)).reshape(B, N, C)

    # one-hot group-membership matrix (C, G)
    gmask = (jnp.arange(C)[:, None] // Cg ==
             jnp.arange(G)[None, :]).astype(jnp.float32)

    # Fold 1/sqrt(C) into Wq/bq, fuse q/k/v weights, cast MXU weights to bf16.
    qscale = float(C) ** -0.5
    wqkv = jnp.concatenate(
        [params["wq"] * qscale, params["wk"], params["wv"]],
        axis=1).astype(jnp.bfloat16)                        # (C, 3C)
    bqkv = jnp.concatenate(
        [params["bq"] * qscale, params["bk"], params["bv"]],
        axis=1).astype(jnp.float32)                         # (1, 3C)
    w3 = params["w3"].astype(jnp.bfloat16)

    kernel = functools.partial(attn_block_kernel, eps=1e-6,
                               n_group_elems=float(N * Cg),
                               channels=C, kv_tile=kv_tile)

    # VMEM budget: double-buffered x/y blocks + weights + in-kernel temporaries.
    est = (4 * N * C * 4                       # x / y blocks (2 buffers each)
           + 2 * (3 * C * C + C * C) * 2       # bf16 Wqkv / W3 (2 buffers)
           + 10 * N * C * 4                    # h, qkv, acc, o, loop carries
           + 2 * N * C * 2                     # bf16 k/v scratch
           + 3 * N * kv_tile * 4)              # s / p tiles
    vmem_limit = int(min(max(2 * est, 32 * 1024 * 1024), 64 * 1024 * 1024))

    scratch_shapes = ([pltpu.VMEM((N, C), jnp.bfloat16),
                       pltpu.VMEM((N, C), jnp.bfloat16)] if num_kv > 1 else [])

    def const2d(shape):
        return pl.BlockSpec(shape, lambda b: (0, 0))

    # TODO(synk): for v7x with B==1, add a query-tile grid axis (two-kernel
    # split so GroupNorm / K / V are not recomputed per tile) to feed both TCs.
    y_bnc = pl.pallas_call(
        kernel,
        out_shape=jax.ShapeDtypeStruct((B, N, C), jnp.float32),
        grid_spec=pltpu.PrefetchScalarGridSpec(
            num_scalar_prefetch=0,
            grid=(B,),
            in_specs=[
                pl.BlockSpec((1, N, C), lambda b: (b, 0, 0)),   # x
                const2d((1, C)),                                 # gamma
                const2d((1, C)),                                 # beta
                const2d((C, G)),                                 # group one-hot
                const2d((C, 3 * C)),                             # Wqkv (bf16)
                const2d((1, 3 * C)),                             # bqkv
                const2d((C, C)),                                 # W3 (bf16)
                const2d((1, C)),                                 # b3
            ],
            out_specs=pl.BlockSpec((1, N, C), lambda b: (b, 0, 0)),
            scratch_shapes=scratch_shapes,
        ),
        compiler_params=pltpu.CompilerParams(
            dimension_semantics=("parallel",),
            vmem_limit_bytes=vmem_limit),
    )(x_bnc, params["gamma"], params["beta"], gmask,
      wqkv, bqkv, w3, params["b3"])

    return jnp.transpose(y_bnc.reshape(B, H, W, C), (0, 3, 1, 2))


def nin_init(key, in_ch, out_ch, init_scale):
    """default_init from the reference (fan_avg / uniform variance scaling)."""
    scale = 1e-10 if init_scale == 0 else init_scale
    fan_avg = (in_ch + out_ch) / 2.0
    limit = math.sqrt(3.0 * scale / fan_avg)
    w = jax.random.uniform(key, (in_ch, out_ch), jnp.float32, -limit, limit)
    b = jnp.zeros((1, out_ch), jnp.float32)
    return w, b


def attn_block_reference(x, params):
    """Pure-JAX f32 reference mirroring the PyTorch module (for validation)."""
    B, C, H, W = x.shape
    G = min(C // 4, 32)
    xg = x.reshape(B, G, C // G, H, W)
    mean = jnp.mean(xg, axis=(2, 3, 4), keepdims=True)
    var = jnp.mean((xg - mean) ** 2, axis=(2, 3, 4), keepdims=True)
    h = ((xg - mean) / jnp.sqrt(var + 1e-6)).reshape(B, C, H, W)
    h = h * params["gamma"].reshape(1, C, 1, 1) + params["beta"].reshape(1, C, 1, 1)
    hb = jnp.transpose(h, (0, 2, 3, 1))                        # (B,H,W,C)
    q = jnp.einsum("bhwi,ik->bhwk", hb, params["wq"]) + params["bq"][0]
    k = jnp.einsum("bhwi,ik->bhwk", hb, params["wk"]) + params["bk"][0]
    v = jnp.einsum("bhwi,ik->bhwk", hb, params["wv"]) + params["bv"][0]
    w = jnp.einsum("bhwc,bijc->bhwij", q, k) * (int(C) ** (-0.5))
    w = jax.nn.softmax(w.reshape(B, H, W, H * W), axis=-1).reshape(B, H, W, H, W)
    o = jnp.einsum("bhwij,bijc->bhwc", w, v)
    o = jnp.einsum("bhwi,ik->bhwk", o, params["w3"]) + params["b3"][0]
    o = jnp.transpose(o, (0, 3, 1, 2))
    return (x + o) / math.sqrt(2.0)


if __name__ == "__main__":
    B, C, H, W = 2, 32, 8, 8
    key = jax.random.PRNGKey(0)
    kx, k0, k1, k2, k3, k4 = jax.random.split(key, 6)

    x = jax.random.normal(kx, (B, C, H, W), jnp.float32)

    wq, bq = nin_init(k0, C, C, 0.1)
    wk, bk = nin_init(k1, C, C, 0.1)
    wv, bv = nin_init(k2, C, C, 0.1)
    w3, b3 = nin_init(k3, C, C, 0.0)   # module default: init_scale=0 -> 1e-10
    params = {
        "gamma": jnp.ones((1, C), jnp.float32),
        "beta": jnp.zeros((1, C), jnp.float32),
        "wq": wq, "bq": bq, "wk": wk, "bk": bk,
        "wv": wv, "bv": bv, "w3": w3, "b3": b3,
    }

    # 1) module-default parameters (NIN_3 init_scale=0), single-KV-tile path.
    y = attn_block(x, params)
    jax.block_until_ready(y)
    y_ref = attn_block_reference(x, params)
    assert jnp.allclose(y, y_ref, atol=1e-4, rtol=1e-4), "mismatch vs reference"

    # 2) nonzero output projection so the bf16 attention path is actually
    #    exercised, with a small KV tile to exercise the online-softmax loop.
    w3b, b3b = nin_init(k4, C, C, 0.1)
    params2 = dict(params, w3=w3b, b3=b3b)
    y2 = attn_block(x, params2, kv_tile=16)
    jax.block_until_ready(y2)
    y2_ref = attn_block_reference(x, params2)
    assert jnp.allclose(y2, y2_ref, atol=1e-2, rtol=1e-2), "mismatch (tiled kv)"

    print("KERNEL_OK")
</pallas_src>

<mosaic_0001>
module attributes {stable_mosaic.version = 11 : i64} {
  func.func @attn_block_kernel(%arg0: i32, %arg1: memref<1x64x32xf32, #tpu.memory_space<vmem>>, %arg2: memref<1x32xf32, #tpu.memory_space<vmem>>, %arg3: memref<1x32xf32, #tpu.memory_space<vmem>>, %arg4: memref<32x8xf32, #tpu.memory_space<vmem>>, %arg5: memref<32x96xbf16, #tpu.memory_space<vmem>>, %arg6: memref<1x96xf32, #tpu.memory_space<vmem>>, %arg7: memref<32x32xbf16, #tpu.memory_space<vmem>>, %arg8: memref<1x32xf32, #tpu.memory_space<vmem>>, %arg9: memref<1x64x32xf32, #tpu.memory_space<vmem>>) attributes {dimension_semantics = [#tpu.dimension_semantics<parallel>], iteration_bounds = array<i64: 2>, scalar_prefetch = 0 : i64, scratch_operands = 0 : i64, tpu.core_type = #tpu.core_type<tc>, window_params = [{transform_indices = @transform_0, window_bounds = array<i64: 1, 64, 32>}, {pipeline_mode = #tpu.pipeline_mode<synchronous>, transform_indices = @transform_1, window_bounds = array<i64: 1, 32>}, {pipeline_mode = #tpu.pipeline_mode<synchronous>, transform_indices = @transform_2, window_bounds = array<i64: 1, 32>}, {pipeline_mode = #tpu.pipeline_mode<synchronous>, transform_indices = @transform_3, window_bounds = array<i64: 32, 8>}, {pipeline_mode = #tpu.pipeline_mode<synchronous>, transform_indices = @transform_4, window_bounds = array<i64: 32, 96>}, {pipeline_mode = #tpu.pipeline_mode<synchronous>, transform_indices = @transform_5, window_bounds = array<i64: 1, 96>}, {pipeline_mode = #tpu.pipeline_mode<synchronous>, transform_indices = @transform_6, window_bounds = array<i64: 32, 32>}, {pipeline_mode = #tpu.pipeline_mode<synchronous>, transform_indices = @transform_7, window_bounds = array<i64: 1, 32>}, {transform_indices = @transform_8, window_bounds = array<i64: 1, 64, 32>}]} {
    %c0 = arith.constant 0 : index
    %c0_0 = arith.constant 0 : index
    %c0_1 = arith.constant 0 : index
    %0 = vector.load %arg1[%c0, %c0_0, %c0_1] : memref<1x64x32xf32, #tpu.memory_space<vmem>>, vector<1x64x32xf32>
    %1 = vector.shape_cast %0 : vector<1x64x32xf32> to vector<64x32xf32>
    %c0_2 = arith.constant 0 : index
    %c0_3 = arith.constant 0 : index
    %2 = vector.load %arg4[%c0_2, %c0_3] : memref<32x8xf32, #tpu.memory_space<vmem>>, vector<32x8xf32>
    %cst = arith.constant dense<0.000000e+00> : vector<32xf32>
    %3 = vector.multi_reduction <add>, %1, %cst [0] : vector<64x32xf32> to vector<32xf32>
    %4 = vector.shape_cast %3 : vector<32xf32> to vector<1x32xf32>
    %cst_4 = arith.constant dense<0.000000e+00> : vector<1x8xf32>
    %5 = tpu.matmul %4, %2, %cst_4 {dimension_numbers = #tpu.dot_dimension_numbers<[1], [0], [0], [1], [0, 0, 1, 1], [], []>} : vector<1x32xf32>, vector<32x8xf32>, vector<1x8xf32> -> vector<1x8xf32>
    %cst_5 = arith.constant 3.906250e-03 : f32
    %6 = vector.broadcast %cst_5 : f32 to vector<1x8xf32>
    %7 = arith.mulf %5, %6 : vector<1x8xf32>
    %cst_6 = arith.constant dense<0.000000e+00> : vector<1x32xf32>
    %8 = tpu.matmul %7, %2, %cst_6 {dimension_numbers = #tpu.dot_dimension_numbers<[1], [1], [0], [0], [0, 0, 1, 0], [], []>} : vector<1x8xf32>, vector<32x8xf32>, vector<1x32xf32> -> vector<1x32xf32>
    %9 = vector.broadcast %8 : vector<1x32xf32> to vector<64x32xf32>
    %10 = arith.subf %1, %9 : vector<64x32xf32>
    %11 = arith.mulf %10, %10 : vector<64x32xf32>
    %cst_7 = arith.constant dense<0.000000e+00> : vector<32xf32>
    %12 = vector.multi_reduction <add>, %11, %cst_7 [0] : vector<64x32xf32> to vector<32xf32>
    %13 = vector.shape_cast %12 : vector<32xf32> to vector<1x32xf32>
    %cst_8 = arith.constant dense<0.000000e+00> : vector<1x8xf32>
    %14 = tpu.matmul %13, %2, %cst_8 {dimension_numbers = #tpu.dot_dimension_numbers<[1], [0], [0], [1], [0, 0, 1, 1], [], []>} : vector<1x32xf32>, vector<32x8xf32>, vector<1x8xf32> -> vector<1x8xf32>
    %cst_9 = arith.constant 3.906250e-03 : f32
    %15 = vector.broadcast %cst_9 : f32 to vector<1x8xf32>
    %16 = arith.mulf %14, %15 : vector<1x8xf32>
    %cst_10 = arith.constant 9.99999997E-7 : f32
    %17 = vector.broadcast %cst_10 : f32 to vector<1x8xf32>
    %18 = arith.addf %16, %17 : vector<1x8xf32>
    %19 = math.rsqrt %18 : vector<1x8xf32>
    %cst_11 = arith.constant dense<0.000000e+00> : vector<1x32xf32>
    %20 = tpu.matmul %19, %2, %cst_11 {dimension_numbers = #tpu.dot_dimension_numbers<[1], [1], [0], [0], [0, 0, 1, 0], [], []>} : vector<1x8xf32>, vector<32x8xf32>, vector<1x32xf32> -> vector<1x32xf32>
    %c0_12 = arith.constant 0 : index
    %c0_13 = arith.constant 0 : index
    %21 = vector.load %arg2[%c0_12, %c0_13] : memref<1x32xf32, #tpu.memory_space<vmem>>, vector<1x32xf32>
    %22 = arith.mulf %20, %21 : vector<1x32xf32>
    %23 = vector.broadcast %22 : vector<1x32xf32> to vector<64x32xf32>
    %24 = arith.mulf %10, %23 : vector<64x32xf32>
    %c0_14 = arith.constant 0 : index
    %c0_15 = arith.constant 0 : index
    %25 = vector.load %arg3[%c0_14, %c0_15] : memref<1x32xf32, #tpu.memory_space<vmem>>, vector<1x32xf32>
    %26 = vector.broadcast %25 : vector<1x32xf32> to vector<64x32xf32>
    %27 = arith.addf %24, %26 : vector<64x32xf32>
    %28 = arith.truncf %27 : vector<64x32xf32> to vector<64x32xbf16>
    %c0_16 = arith.constant 0 : index
    %c0_17 = arith.constant 0 : index
    %29 = vector.load %arg5[%c0_16, %c0_17] : memref<32x96xbf16, #tpu.memory_space<vmem>>, vector<32x96xbf16>
    %cst_18 = arith.constant dense<0.000000e+00> : vector<64x96xf32>
    %30 = tpu.matmul %28, %29, %cst_18 {dimension_numbers = #tpu.dot_dimension_numbers<[1], [0], [0], [1], [0, 0, 1, 1], [], []>} : vector<64x32xbf16>, vector<32x96xbf16>, vector<64x96xf32> -> vector<64x96xf32>
    %c0_19 = arith.constant 0 : index
    %c0_20 = arith.constant 0 : index
    %31 = vector.load %arg6[%c0_19, %c0_20] : memref<1x96xf32, #tpu.memory_space<vmem>>, vector<1x96xf32>
    %32 = vector.broadcast %31 : vector<1x96xf32> to vector<64x96xf32>
    %33 = arith.addf %30, %32 : vector<64x96xf32>
    %34 = vector.extract_strided_slice %33 {offsets = [0, 0], sizes = [64, 32], strides = [1, 1]} : vector<64x96xf32> to vector<64x32xf32>
    %35 = arith.truncf %34 : vector<64x32xf32> to vector<64x32xbf16>
    %36 = vector.extract_strided_slice %33 {offsets = [0, 32], sizes = [64, 32], strides = [1, 1]} : vector<64x96xf32> to vector<64x32xf32>
    %37 = arith.truncf %36 : vector<64x32xf32> to vector<64x32xbf16>
    %38 = vector.extract_strided_slice %33 {offsets = [0, 64], sizes = [64, 32], strides = [1, 1]} : vector<64x96xf32> to vector<64x32xf32>
    %39 = arith.truncf %38 : vector<64x32xf32> to vector<64x32xbf16>
    %cst_21 = arith.constant dense<0.000000e+00> : vector<64x64xf32>
    %40 = tpu.matmul %35, %37, %cst_21 {dimension_numbers = #tpu.dot_dimension_numbers<[1], [1], [0], [0], [0, 0, 1, 0], [], []>} : vector<64x32xbf16>, vector<64x32xbf16>, vector<64x64xf32> -> vector<64x64xf32>
    %cst_22 = arith.constant dense<0xFF800000> : vector<64xf32>
    %41 = vector.multi_reduction <maximumf>, %40, %cst_22 [1] : vector<64x64xf32> to vector<64xf32>
    %42 = vector.shape_cast %41 : vector<64xf32> to vector<64x1xf32>
    %43 = vector.broadcast %42 : vector<64x1xf32> to vector<64x64xf32>
    %44 = arith.subf %40, %43 : vector<64x64xf32>
    %45 = math.exp %44 : vector<64x64xf32>
    %cst_23 = arith.constant dense<0.000000e+00> : vector<64xf32>
    %46 = vector.multi_reduction <add>, %45, %cst_23 [1] : vector<64x64xf32> to vector<64xf32>
    %47 = vector.shape_cast %46 : vector<64xf32> to vector<64x1xf32>
    %48 = arith.truncf %45 : vector<64x64xf32> to vector<64x64xbf16>
    %cst_24 = arith.constant dense<0.000000e+00> : vector<64x32xf32>
    %49 = tpu.matmul %48, %39, %cst_24 {dimension_numbers = #tpu.dot_dimension_numbers<[1], [0], [0], [1], [0, 0, 1, 1], [], []>} : vector<64x64xbf16>, vector<64x32xbf16>, vector<64x32xf32> -> vector<64x32xf32>
    %50 = tpu.reciprocal %47 {approx = true} : vector<64x1xf32> -> vector<64x1xf32>
    %51 = vector.broadcast %50 : vector<64x1xf32> to vector<64x32xf32>
    %52 = arith.mulf %49, %51 : vector<64x32xf32>
    %53 = arith.truncf %52 : vector<64x32xf32> to vector<64x32xbf16>
    %c0_25 = arith.constant 0 : index
    %c0_26 = arith.constant 0 : index
    %54 = vector.load %arg7[%c0_25, %c0_26] : memref<32x32xbf16, #tpu.memory_space<vmem>>, vector<32x32xbf16>
    %cst_27 = arith.constant dense<0.000000e+00> : vector<64x32xf32>
    %55 = tpu.matmul %53, %54, %cst_27 {dimension_numbers = #tpu.dot_dimension_numbers<[1], [0], [0], [1], [0, 0, 1, 1], [], []>} : vector<64x32xbf16>, vector<32x32xbf16>, vector<64x32xf32> -> vector<64x32xf32>
    %c0_28 = arith.constant 0 : index
    %c0_29 = arith.constant 0 : index
    %56 = vector.load %arg8[%c0_28, %c0_29] : memref<1x32xf32, #tpu.memory_space<vmem>>, vector<1x32xf32>
    %57 = vector.broadcast %56 : vector<1x32xf32> to vector<64x32xf32>
    %58 = arith.addf %55, %57 : vector<64x32xf32>
    %59 = arith.addf %1, %58 : vector<64x32xf32>
    %cst_30 = arith.constant 0.707106769 : f32
    %60 = vector.broadcast %cst_30 : f32 to vector<64x32xf32>
    %61 = arith.mulf %59, %60 : vector<64x32xf32>
    %c0_31 = arith.constant 0 : index
    %c0_32 = arith.constant 0 : index
    %c0_33 = arith.constant 0 : index
    %62 = vector.load %arg9[%c0_31, %c0_32, %c0_33] : memref<1x64x32xf32, #tpu.memory_space<vmem>>, vector<1x64x32xf32>
    %63 = vector.shape_cast %62 : vector<1x64x32xf32> to vector<64x32xf32>
    %64 = vector.shape_cast %61 : vector<64x32xf32> to vector<1x64x32xf32>
    tpu.vector_store %arg9[%c0_31, %c0_32, %c0_33], %64 {strides = array<i32>} : memref<1x64x32xf32, #tpu.memory_space<vmem>>, vector<1x64x32xf32>,
    return
  }
  func.func @transform_0(%arg0: i32) -> (i32, i32, i32) {
    %c0_i32 = arith.constant 0 : i32
    %c0_i32_0 = arith.constant 0 : i32
    %c0_i32_1 = arith.constant 0 : i32
    return %arg0, %c0_i32, %c0_i32_0 : i32, i32, i32
  }
  func.func @transform_1(%arg0: i32) -> (i32, i32) {
    %c0_i32 = arith.constant 0 : i32
    %c0_i32_0 = arith.constant 0 : i32
    %c0_i32_1 = arith.constant 0 : i32
    return %c0_i32, %c0_i32_0 : i32, i32
  }
  func.func @transform_2(%arg0: i32) -> (i32, i32) {
    %c0_i32 = arith.constant 0 : i32
    %c0_i32_0 = arith.constant 0 : i32
    %c0_i32_1 = arith.constant 0 : i32
    return %c0_i32, %c0_i32_0 : i32, i32
  }
  func.func @transform_3(%arg0: i32) -> (i32, i32) {
    %c0_i32 = arith.constant 0 : i32
    %c0_i32_0 = arith.constant 0 : i32
    %c0_i32_1 = arith.constant 0 : i32
    return %c0_i32, %c0_i32_0 : i32, i32
  }
  func.func @transform_4(%arg0: i32) -> (i32, i32) {
    %c0_i32 = arith.constant 0 : i32
    %c0_i32_0 = arith.constant 0 : i32
    %c0_i32_1 = arith.constant 0 : i32
    return %c0_i32, %c0_i32_0 : i32, i32
  }
  func.func @transform_5(%arg0: i32) -> (i32, i32) {
    %c0_i32 = arith.constant 0 : i32
    %c0_i32_0 = arith.constant 0 : i32
    %c0_i32_1 = arith.constant 0 : i32
    return %c0_i32, %c0_i32_0 : i32, i32
  }
  func.func @transform_6(%arg0: i32) -> (i32, i32) {
    %c0_i32 = arith.constant 0 : i32
    %c0_i32_0 = arith.constant 0 : i32
    %c0_i32_1 = arith.constant 0 : i32
    return %c0_i32, %c0_i32_0 : i32, i32
  }
  func.func @transform_7(%arg0: i32) -> (i32, i32) {
    %c0_i32 = arith.constant 0 : i32
    %c0_i32_0 = arith.constant 0 : i32
    %c0_i32_1 = arith.constant 0 : i32
    return %c0_i32, %c0_i32_0 : i32, i32
  }
  func.func @transform_8(%arg0: i32) -> (i32, i32, i32) {
    %c0_i32 = arith.constant 0 : i32
    %c0_i32_0 = arith.constant 0 : i32
    %c0_i32_1 = arith.constant 0 : i32
    return %arg0, %c0_i32, %c0_i32_0 : i32, i32, i32
  }
}

</mosaic_0001>

<bundles_post_ra>
// kernel: tpu_custom_call.1
= control target key start
LH: loop header
LB: loop body
LE: loop exit
PB: predicated region body
PF: predicated region fallthrough
CT: control target
= control target key end

     0   :  { %s1631_s27 = smov 0   ;;  %s1867_s0 = inlined_call_operand.vmem [shape: f32[2,64,32], index: 0, kind: input, shape index: {}]   ;;  %s1868_s1 = inlined_call_operand.vmem [shape: f32[1,32], index: 1, kind: input, shape index: {}]   ;;  %s1869_s2 = inlined_call_operand.vmem [shape: f32[1,32], index: 2, kind: input, shape index: {}]   ;;  %s1870_s3 = inlined_call_operand.vmem [shape: f32[32,8], index: 3, kind: input, shape index: {}]   ;;  %s1871_s4 = inlined_call_operand.vmem [shape: bf16[32,96], index: 4, kind: input, shape index: {}]   ;;  %s1872_s5 = inlined_call_operand.vmem [shape: f32[1,96], index: 5, kind: input, shape index: {}]   ;;  %s1873_s6 = inlined_call_operand.vmem [shape: bf16[32,32], index: 6, kind: input, shape index: {}]   ;;  %s1874_s7 = inlined_call_operand.vmem [shape: f32[1,32], index: 7, kind: input, shape index: {}]   ;;  %s1875_s8 = inlined_call_operand.vmem [shape: f32[2,64,32], index: 8, kind: output, shape index: {}]  }
   0x1 LB: > { %s1294_s28 = sadd.s32 4294967295, %s1579_s27   ;;  %p1298_p0 = scmp.ge.s32.totalorder %s1579_s27, 1  ;;  %s1579_s27 = sphi %s1631_s27, %s18_s27  }
   0x2   : > { %p262_p1 = scmp.lt.s32.totalorder %s1579_s27, 3 }
   0x4   : > { %p263_p2 = pnand %p1298_p0, %p262_p1 }
   0x5   : > { %v315_v0 = vld [vmem:[%s1870_s3] sm:$0xff] (!%p263_p2)  ;;  %v316_v1 = vld [vmem:[%s1870_s3 + $0x8] sm:$0xff] (!%p263_p2)  ;;  %v317_v2 = vld [vmem:[%s1870_s3 + $0x10] sm:$0xff] (!%p263_p2)  ;;  %v1581_v3 = vmov (!%p263_p2), 0.0|0.0   ;;  %vm1582_vm0 = vmmov (!%p263_p2), 0   ;;  %v1583_v6 = vmov (!%p263_p2), 0.0   ;;  %v501_v41 = vlaneseq (!%p263_p2) }
   0x6   : > { %266 = sbr.rel (%p263_p2) target bundleno = 2157 (0x86d), region = 52  ;;  %1490 = vmatprep.subr.bf16.mxu0 (!%p263_p2), %v1581_v3  ;;  %v1649_v4 = vpack.c.bf16 (!%p263_p2), %v316_v1, %v315_v0  ;;  %v318_v5 = vld [vmem:[%s1870_s3 + $0x18] sm:$0xff] (!%p263_p2)  ;;  %1398 = vmatprep.mubr.msk.f32.mxu0 (!%p263_p2), %vm1582_vm0, %v1583_v6  ;;  %p296_p3 = scmp.lt.s32.totalorder (!%p263_p2), %s1294_s28, 1  ;;  %vm415_vm1 = vcmask (!%p263_p2), 64512   ;;  %vm319_vm3 = vcmask (!%p263_p2), 261120   ;;  %vm929_vm4 = vcmask (!%p263_p2), 523264  }
   0x7   : > { %1496 = vmatprep.subr.bf16.mxu1 (!%p263_p2), %v1581_v3  ;;  %vm1659_vm2 = vmpackc.low (!%p263_p2), %vm415_vm1, %vm415_vm1  ;;  %1409 = vmatprep.mubr.msk.f32.mxu1 (!%p263_p2), %vm1582_vm0, %v1583_v6  ;;  %v1666_v8 = vpack.c.bf16 (!%p263_p2), %v318_v5, %v317_v2  ;;  %v1726_v42 = vshrl.u32 (!%p263_p2), %v501_v41, 7  ;;  %s1584_s9 = smov (!%p263_p2), 96   ;;  %s1585_s10 = smov (!%p263_p2), 64  }
   0x8   : > { %1492 = vmatpush3.bf16.msra.mxu0 (!%p263_p2), %v1649_v4  ;;  %1499 = vmatpush3.bf16.xpose.msk.msra.mxu1 (!%p263_p2), %vm1659_vm2, %v1649_v4 }
   0x9   : > { %1493 = vmatprep.subr.bf16.mxu0 (!%p263_p2), %v1581_v3  ;;  %1500 = vmatprep.subr.bf16.mxu1 (!%p263_p2), %v1581_v3  ;;  %v503_v43 = vsub.s32 (!%p263_p2), 0, %v1726_v42 }
   0xc   : > { %1495 = vmatpush3.bf16.msra.mxu0 (!%p263_p2), %v1666_v8 }
   0xd   : > { %s1879_s28 = smov (!%p296_p3, %s1294_s28), 1  ;;  %1504 = vmatprep.subr.bf16.mxu0 %v1581_v3 }
   0xe   : > { %s1340_s15 = sshll.u32 %s1879_s28, 6 }
   0xf   : > { %s300_s18 = scalar_lea.vmem %s1867_s0, %s1340_s15  ;;  %s1839_s20 = scalar_lea.vmem %s1875_s8, %s1340_s15 }
  0x10   : > { %v1682_v9 = vld [vmem:[%s300_s18] sm:$0xff]  ;;  %v1684_v10 = vld [vmem:[%s300_s18 + $0x8] sm:$0xff]  ;;  %v1686_v11 = vld [vmem:[%s300_s18 + $0x10] sm:$0xff]  ;;  %1503 = vmatpush3.bf16.xpose.msk.msra.mxu1 %vm1659_vm2, %v1666_v8 }
  0x11   : > { %v1688_v12 = vld [vmem:[%s300_s18 + $0x18] sm:$0xff]  ;;  %v320_v13 = vsel %vm319_vm3, %v1682_v9, 0.0  ;;  %v321_v14 = vsel %vm319_vm3, %v1684_v10, 0.0  ;;  %v323_v15 = vsel %vm319_vm3, %v1686_v11, 0.0  ;;  %v1697_v16 = vld [vmem:[%s300_s18 + $0x20] sm:$0xff]  ;;  %v1701_v19 = vld [vmem:[%s300_s18 + $0x28] sm:$0xff] }
  0x12   : > { %v322_v17 = vadd.f32 %v321_v14, %v320_v13  ;;  %v325_v18 = vsel %vm319_vm3, %v1688_v12, 0.0  ;;  %v327_v21 = vsel %vm319_vm3, %v1697_v16, 0.0  ;;  %v1708_v22 = vld [vmem:[%s300_s18 + $0x30] sm:$0xff]  ;;  %v329_v24 = vsel %vm319_vm3, %v1701_v19, 0.0  ;;  %v1712_v25 = vld [vmem:[%s300_s18 + $0x38] sm:$0xff] }
  0x13   : > { %v331_v27 = vsel %vm319_vm3, %v1708_v22, 0.0  ;;  %v333_v29 = vsel %vm319_vm3, %v1712_v25, 0.0 }
  0x14   : > { %v324_v20 = vadd.f32 %v323_v15, %v322_v17 }
  0x16   : > { %v326_v23 = vadd.f32 %v325_v18, %v324_v20 }
  0x18   : > { %v328_v26 = vadd.f32 %v327_v21, %v326_v23 }
  0x1a   : > { %v330_v28 = vadd.f32 %v329_v24, %v328_v26 }
  0x1c   : > { %v332_v30 = vadd.f32 %v331_v27, %v330_v28 }
  0x1e   : > { %v334_v31 = vadd.f32 %v333_v29, %v332_v30 }
  0x20   : > { %v335_v32 = vrot.slane %v334_v31, 4 }
  0x22   : > { %v336_v33 = vadd.f32 %v335_v32, %v334_v31 }
  0x24   : > { %v337_v34 = vrot.slane %v336_v33, 2 }
  0x26   : > { %v338_v35 = vadd.f32 %v337_v34, %v336_v33 }
  0x28   : > { %v339_v36 = vrot.slane %v338_v35, 1 }
  0x2a   : > { %v340_v37 = vadd.f32 %v339_v36, %v338_v35 }
  0x2c   : > { %1399 = vmatmul.mubr.msk.f32.vlgmr.msra.gmra.mrb[0].mxu0 %vm319_vm3, %v340_v37 }
  0x2d   : > { %1506 = vmatpush3.bf16.msra.mxu0 %v1649_v4  ;;  %1420 = vmatprep.mubr.msk.f32.mxu0 %vm1582_vm0, %v1583_v6 }
  0x2e   : > { %1507 = vmatprep.subr.bf16.mxu0 %v1581_v3 }
  0x31   : > { %1509 = vmatpush3.bf16.msra.mxu0 %v1666_v8 }
  0x32   : > { %1510 = vmatprep.subr.bf16.mxu0 %v1581_v3 }
  0xff   : > { %v410_v38 = vpop.f32.mrb[0].mxu0 }
 0x100   : > { %v414_v39 = vmul.f32 0.00390625, %v410_v38  ;;  %v1400_v40 = vpop.f32.mrb[1].mxu0 }
 0x101   : > { %v1315_v40 = vld [vmem:[%s1869_s2] ss:$0 sm:$0xff] }
 0x102   : > { %1410 = vmatmul.mubr.msk.f32.vlgmr.msra.gmra.mrb[0].mxu1 %vm415_vm1, %v414_v39 }
 0x1d5   : > { %v497_v44 = vpop.f32.mrb[0].mxu1 }
 0x1d6   : > { %v504_v45 = vrot.slane %v497_v44, %v503_v43  ;;  %v1411_v46 = vpop.f32.mrb[1].mxu1 }
 0x1d8   : > { %v505_v47 = vsub.f32 %v1682_v9, %v504_v45  ;;  %v506_v48 = vsub.f32 %v1684_v10, %v504_v45  ;;  %v507_v49 = vsub.f32 %v1686_v11, %v504_v45  ;;  %v508_v50 = vsub.f32 %v1688_v12, %v504_v45 }
 0x1d9   : > { %v509_v51 = vsub.f32 %v1697_v16, %v504_v45  ;;  %v510_v55 = vsub.f32 %v1701_v19, %v504_v45  ;;  %v511_v60 = vsub.f32 %v1708_v22, %v504_v45  ;;  %v512_v0 = vsub.f32 %v1712_v25, %v504_v45 }
 0x1da   : > { %v513_v52 = vmul.f32 %v505_v47, %v505_v47  ;;  %v514_v53 = vmul.f32 %v506_v48, %v506_v48  ;;  %v515_v54 = vmul.f32 %v507_v49, %v507_v49  ;;  %v516_v56 = vmul.f32 %v508_v50, %v508_v50 }
 0x1db   : > { %v517_v61 = vmul.f32 %v509_v51, %v509_v51  ;;  %v518_v1 = vmul.f32 %v510_v55, %v510_v55  ;;  %v519_v13 = vmul.f32 %v511_v60, %v511_v60  ;;  %v520_v17 = vmul.f32 %v512_v0, %v512_v0 }
 0x1dc   : > { %v521_v57 = vsel %vm319_vm3, %v513_v52, 0.0  ;;  %v522_v58 = vsel %vm319_vm3, %v514_v53, 0.0  ;;  %v524_v62 = vsel %vm319_vm3, %v515_v54, 0.0  ;;  %v526_v2 = vsel %vm319_vm3, %v516_v56, 0.0 }
 0x1dd   : > { %v523_v59 = vadd.f32 %v522_v58, %v521_v57  ;;  %v528_v14 = vsel %vm319_vm3, %v517_v61, 0.0  ;;  %v530_v18 = vsel %vm319_vm3, %v518_v1, 0.0  ;;  %v532_v21 = vsel %vm319_vm3, %v519_v13, 0.0 }
 0x1de   : > { %v534_v24 = vsel %vm319_vm3, %v520_v17, 0.0 }
 0x1df   : > { %v525_v63 = vadd.f32 %v524_v62, %v523_v59 }
 0x1e1   : > { %v527_v5 = vadd.f32 %v526_v2, %v525_v63 }
 0x1e3   : > { %v529_v15 = vadd.f32 %v528_v14, %v527_v5 }
 0x1e5   : > { %v531_v20 = vadd.f32 %v530_v18, %v529_v15 }
 0x1e7   : > { %v533_v23 = vadd.f32 %v532_v21, %v531_v20 }
 0x1e9   : > { %v535_v26 = vadd.f32 %v534_v24, %v533_v23 }
 0x1eb   : > { %v536_v27 = vrot.slane %v535_v26, 4 }
 0x1ed   : > { %v537_v28 = vadd.f32 %v536_v27, %v535_v26 }
 0x1ef   : > { %v538_v29 = vrot.slane %v537_v28, 2 }
 0x1f1   : > { %v539_v30 = vadd.f32 %v538_v29, %v537_v28 }
 0x1f3   : > { %v540_v31 = vrot.slane %v539_v30, 1 }
 0x1f5   : > { %v541_v32 = vadd.f32 %v540_v31, %v539_v30 }
 0x1f7   : > { %1421 = vmatmul.mubr.msk.f32.vlgmr.msra.gmra.mrb[2].mxu0 %vm319_vm3, %v541_v32 }
 0x1f8   : > { %1513 = vmatpush3.bf16.xpose.msk.msra.mxu0 %vm1659_vm2, %v1649_v4  ;;  %1431 = vmatprep.mubr.msk.f32.mxu0 %vm1582_vm0, %v1583_v6  ;;  %v1535_v4 = vld [vmem:[%s1871_s4] sm:$0xff]  }
 0x1f9   : > { %1514 = vmatprep.subr.bf16.mxu0 %v1581_v3  ;;  %v1536_v3 = vld [vmem:[%s1871_s4 + $0x8] sm:$0xff]   ;;  %1434 = vmatprep.subr.bf16.mxu1 %v1535_v4  ;;  %v691_v6 = vld [vmem:[%s1868_s1] sm:$0x1] }
 0x1fa   : > { %1435 = vmatpush3.bf16.msra.mxu1 %v1535_v4 }
 0x1fb   : > { %1436 = vmatprep.subr.bf16.mxu1 %v1536_v3 }
 0x1fe   : > { %1437 = vmatpush3.bf16.msra.mxu1 %v1536_v3 }
 0x200   : > { %1517 = vmatpush3.bf16.xpose.msk.msra.mxu0 %vm1659_vm2, %v1666_v8 }
 0x2ca   : > { %v611_v33 = vpop.f32.mrb[2].mxu0 }
 0x2cb   : > { %v615_v34 = vmul.f32 0.00390625, %v611_v33  ;;  %v1422_v35 = vpop.f32.mrb[3].mxu0 }
 0x2cd   : > { %v616_v36 = vadd.f32 1e-06, %v615_v34 }
 0x2cf   : > { %1539 = vrsqrt.f32 %v616_v36 }
 0x2d9   : > { %v1540_v37 = vpop.eup %1539 }
 0x2da   : > { %1432 = vmatmul.mubr.msk.f32.vlgmr.msra.gmra.mrb[4].mxu0 %vm415_vm1, %v1540_v37 }
 0x3ad   : > { %v687_v7 = vpop.f32.mrb[4].mxu0 }
 0x3ae   : > { %v692_v8 = vmul.f32 %v691_v6, %v687_v7  ;;  %v1433_v38 = vpop.f32.mrb[5].mxu0 }
 0x3b0   : > { %v696_v39 = vrot.slane %v692_v8, %v503_v43 }
 0x3b2   : > { %v697_v41 = vmul.f32 %v696_v39, %v505_v47  ;;  %v698_v44 = vmul.f32 %v696_v39, %v506_v48  ;;  %v699_v45 = vmul.f32 %v696_v39, %v507_v49  ;;  %v700_v46 = vmul.f32 %v696_v39, %v508_v50 }
 0x3b3   : > { %v701_v52 = vmul.f32 %v696_v39, %v509_v51  ;;  %v702_v53 = vmul.f32 %v696_v39, %v510_v55  ;;  %v703_v42 = vmul.f32 %v696_v39, %v511_v60  ;;  %v704_v43 = vmul.f32 %v696_v39, %v512_v0  ;;  %v1316_v51 = vld [vmem:[%s1872_s5] ss:$0 sm:$0xff] }
 0x3b4   : > { %v712_v54 = vadd.f32 %v1315_v40, %v697_v41  ;;  %v713_v56 = vadd.f32 %v1315_v40, %v698_v44  ;;  %v714_v57 = vadd.f32 %v1315_v40, %v699_v45  ;;  %v715_v58 = vadd.f32 %v1315_v40, %v700_v46 }
 0x3b5   : > { %v716_v59 = vadd.f32 %v1315_v40, %v701_v52  ;;  %v717_v61 = vadd.f32 %v1315_v40, %v702_v53  ;;  %v718_v47 = vadd.f32 %v1315_v40, %v703_v42  ;;  %v719_v48 = vadd.f32 %v1315_v40, %v704_v43 }
 0x3b6   : > { %v720_v62 = vpack.c.bf16 %v713_v56, %v712_v54  ;;  %v721_v63 = vpack.c.bf16 %v715_v58, %v714_v57 }
 0x3b7   : > { %v722_v1 = vpack.c.bf16 %v717_v61, %v716_v59  ;;  %v723_v49 = vpack.c.bf16 %v719_v48, %v718_v47 }
 0x3b8   : > { %1438 = vmatprep.mubr.msk.bf16.mxu1 %vm319_vm3, %v720_v62 }
 0x3b9   : > { %1439 = vmatmul.mubr.msk.bf16.vlgmr.msra.gmra.mrb[4].mxu1 %vm319_vm3, %v721_v63 }
 0x3ba   : > { %1442 = vmatprep.mubr.msk.bf16.mxu1 %vm319_vm3, %v722_v1 }
 0x3c1   : > { %1443 = vmatmul.mubr.msk.bf16.gmra.mrb[8].mxu1 %vm319_vm3, %v723_v49 }
 0x48c   : > { %v1440_v50 = vpop.f32.mrb[4].mxu1 }
 0x48d   : > { %v793_v55 = vpop.f32.mrb[5].mxu1  ;;  %v802_v0 = vadd.f32 %v1440_v50, %v1316_v51 }
 0x48e   : > { %v1441_v60 = vpop.f32.mrb[6].mxu1  ;;  %v794_v13 = vadd.f32 %v1316_v51, %v793_v55 }
 0x48f   : > { %v805_v2 = vadd.f32 %v1441_v60, %v1316_v51  ;;  %v796_v5 = vpop.f32.mrb[7].mxu1 }
 0x490   : > { %v797_v14 = vadd.f32 %v1316_v51, %v796_v5 }
 0x491   : > { %v1779_v15 = vpack.c.bf16 %v805_v2, %v802_v0 }
 0x492   : > { %v824_v17 = vpack.c.bf16 %v797_v14, %v794_v13 }
 0x494   : > { %v1444_v18 = vpop.f32.mrb[8].mxu1  ;;  %832 = vrot.lane.b32.xlu0 %v824_v17, %s1584_s9  ;;  %1454 = vmatprep.mubr.msk.bf16.mxu1 %vm319_vm3, %v824_v17 }
 0x495   : > { %v809_v20 = vpop.f32.mrb[9].mxu1  ;;  %v818_v23 = vadd.f32 %v1444_v18, %v1316_v51 }
 0x496   : > { %v1445_v21 = vpop.f32.mrb[10].mxu1  ;;  %v810_v27 = vadd.f32 %v1316_v51, %v809_v20 }
 0x497   : > { %v821_v24 = vadd.f32 %v1445_v21, %v1316_v51  ;;  %v812_v26 = vpop.f32.mrb[11].mxu1 }
 0x498   : > { %v813_v28 = vadd.f32 %v1316_v51, %v812_v26  ;;  %834 = vrot.lane.b32.xlu0 %v1779_v15, %s1584_s9 }
 0x499   : > { %v827_v29 = vpack.c.bf16 %v821_v24, %v818_v23 }
 0x49a   : > { %v826_v30 = vpack.c.bf16 %v813_v28, %v810_v27 }
 0x49c   : > { %836 = vrot.lane.b32.xlu1 %v826_v30, %s1584_s9 }
 0x4a0   : > { %838 = vrot.lane.b32.xlu1 %v827_v29, %s1584_s9 }
 0x4a4   : > { %1006 = vrot.lane.b32.xlu1 %v824_v17, %s1585_s10 }
 0x506   : > { %v833_v31 = vpop.permute.xlu0 %832 }
 0x507   : > { %v853_v32 = vsel %vm319_vm3, %v833_v31, 0  ;;  %1518 = vmatprep.subr.msk.bf16.mxu1 %vm319_vm3, %v833_v31 }
 0x508   : > { %1447 = vmatpush3.bf16.xpose.msra.mxu1 %v853_v32 }
 0x50a   : > { %v835_v33 = vpop.permute.xlu0 %834 }
 0x50b   : > { %1519 = vmatprep.subr.msk.bf16.mxu1 %vm319_vm3, %v835_v33  ;;  %v856_v35 = vsel %vm319_vm3, %v835_v33, 0 }
 0x50e   : > { %v837_v34 = vpop.permute.xlu1 %836 }
 0x50f   : > { %v859_v4 = vsel %vm319_vm3, %v837_v34, 0 }
 0x510   : > { %1449 = vmatpush3.bf16.xpose.msra.mxu1 %v856_v35 }
 0x511   : > { %1520 = vmatprep.subr.msk.bf16.mxu1 %vm319_vm3, %v837_v34 }
 0x512   : > { %v839_v36 = vpop.permute.xlu1 %838 }
 0x513   : > { %v862_v3 = vsel %vm319_vm3, %v839_v36, 0 }
 0x516   : > { %v1007_v37 = vpop.permute.xlu1 %1006 }
 0x517   : > { %1462 = vmatprep.subr.bf16.mxu0 %v1007_v37 }
 0x518   : > { %1451 = vmatpush3.bf16.xpose.msra.mxu1 %v859_v4  ;;  %1463 = vmatpush3.bf16.msra.mxu0 %v1007_v37 }
 0x519   : > { %1521 = vmatprep.subr.msk.bf16.mxu1 %vm319_vm3, %v839_v36 }
 0x520   : > { %1453 = vmatpush3.bf16.xpose.msra.mxu1 %v862_v3 }
 0x527   : > { %1455 = vmatmul.mubr.msk.bf16.vlgmr.msra.gmra.mrb[12].mxu1 %vm319_vm3, %v1779_v15 }
 0x528   : > { %1458 = vmatprep.mubr.msk.bf16.mxu1 %vm319_vm3, %v826_v30 }
 0x52f   : > { %1459 = vmatmul.mubr.msk.bf16.gmra.mrb[16].mxu1 %vm319_vm3, %v827_v29 }
 0x5fa   : > { %v1456_v6 = vpop.f32.mrb[12].mxu1 }
 0x5fb   : > { %v898_v7 = vpop.f32.mrb[13].mxu1  ;;  %v936_v8 = vsel %vm929_vm4, %v1456_v6, -inf }
 0x5fc   : > { %937 = vmax.xlane.f32.xlu0 %v936_v8  ;;  %v1457_v38 = vpop.f32.mrb[14].mxu1  ;;  %v930_v41 = vsel %vm929_vm4, %v898_v7, -inf }
 0x5fd   : > { %v901_v39 = vpop.f32.mrb[15].mxu1  ;;  %v939_v46 = vsel %vm929_vm4, %v1457_v38, -inf }
 0x5fe   : > { %v933_v40 = vsel %vm929_vm4, %v901_v39, -inf }
 0x5ff   : > { %934 = vmax.xlane.f32.xlu1 %v933_v40 }
 0x600   : > { %931 = vmax.xlane.f32.xlu0 %v930_v41 }
 0x602   : > { %v1460_v44 = vpop.f32.mrb[16].mxu1 }
 0x603   : > { %v914_v45 = vpop.f32.mrb[17].mxu1  ;;  %v948_v52 = vsel %vm929_vm4, %v1460_v44, -inf }
 0x604   : > { %940 = vmax.xlane.f32.xlu0 %v939_v46  ;;  %949 = vmax.xlane.f32.xlu1 %v948_v52  ;;  %v1461_v53 = vpop.f32.mrb[18].mxu1  ;;  %v942_v56 = vsel %vm929_vm4, %v914_v45, -inf }
 0x605   : > { %v917_v54 = vpop.f32.mrb[19].mxu1  ;;  %v951_v57 = vsel %vm929_vm4, %v1461_v53, -inf }
 0x606   : > { %v945_v58 = vsel %vm929_vm4, %v917_v54, -inf }
 0x608   : > { %943 = vmax.xlane.f32.xlu1 %v942_v56  ;;  %952 = vmax.xlane.f32.xlu0 %v951_v57 }
 0x60c   : > { %946 = vmax.xlane.f32.xlu0 %v945_v58 }
 0x619   : > { %1010 = vrot.lane.b32.xlu1 %v826_v30, %s1585_s10 }
 0x61d   : > { %1012 = vrot.lane.b32.xlu1 %v827_v29, %s1585_s10 }
 0x622   : > { %1008 = vrot.lane.b32.xlu0 %v1779_v15, %s1585_s10 }
 0x689   : > { %v938_v59 = vpop.xlane.xlu0 %937 }
 0x68a   : > { %v956_v61 = vsub.f32 %v1456_v6, %v938_v59 }
 0x68c   : > { %v935_v62 = vpop.xlane.xlu1 %934  ;;  %v966_v47 = vmul.f32 1.442695, %v956_v61 }
 0x68d   : > { %v955_v63 = vsub.f32 %v901_v39, %v935_v62  ;;  %v932_v42 = vpop.xlane.xlu0 %931 }
 0x68e   : > { %v954_v43 = vsub.f32 %v898_v7, %v932_v42 }
 0x68f   : > { %v964_v1 = vmul.f32 1.442695, %v955_v63 }
 0x690   : > { %v962_v48 = vmul.f32 1.442695, %v954_v43 }
 0x691   : > { %1541 = vpow2.f32 %v964_v1  ;;  %v941_v49 = vpop.xlane.xlu0 %940  ;;  %v950_v50 = vpop.xlane.xlu1 %949 }
 0x692   : > { %1543 = vpow2.f32 %v962_v48  ;;  %v957_v51 = vsub.f32 %v1457_v38, %v941_v49  ;;  %v960_v55 = vsub.f32 %v1460_v44, %v950_v50  ;;  %v1537_v44 = vld [vmem:[%s1873_s6] sm:$0xff]  }
 0x693   : > { %1545 = vpow2.f32 %v966_v47 }
 0x694   : > { %v968_v60 = vmul.f32 1.442695, %v957_v51  ;;  %v974_v0 = vmul.f32 1.442695, %v960_v55 }
 0x695   : > { %v944_v2 = vpop.xlane.xlu1 %943  ;;  %v953_v5 = vpop.xlane.xlu0 %952 }
 0x696   : > { %1547 = vpow2.f32 %v968_v60  ;;  %v958_v13 = vsub.f32 %v914_v45, %v944_v2  ;;  %v961_v14 = vsub.f32 %v1461_v53, %v953_v5  ;;  %v1538_v45 = vld [vmem:[%s1873_s6 + $0x8] sm:$0xff]  }
 0x697   : > { %1549 = vpow2.f32 %v974_v0 }
 0x698   : > { %v970_v15 = vmul.f32 1.442695, %v958_v13  ;;  %v976_v17 = vmul.f32 1.442695, %v961_v14 }
 0x699   : > { %v947_v18 = vpop.xlane.xlu0 %946  ;;  %v1011_v27 = vpop.permute.xlu1 %1010 }
 0x69a   : > { %1551 = vpow2.f32 %v970_v15  ;;  %v959_v20 = vsub.f32 %v917_v54, %v947_v18 }
 0x69b   : > { %v1542_v21 = vpop.eup %1541  ;;  %1553 = vpow2.f32 %v976_v17 }
 0x69c   : > { %v1544_v23 = vpop.eup %1543  ;;  %v972_v24 = vmul.f32 1.442695, %v959_v20  ;;  %v981_v26 = vsel %vm929_vm4, %v1542_v21, 0.0 }
 0x69d   : > { %982 = vadd.xlane.f32.xlu1 %v981_v26  ;;  %v1009_v28 = vpop.permute.xlu0 %1008  ;;  %v978_v29 = vsel %vm929_vm4, %v1544_v23, 0.0  ;;  %v1002_v30 = vpack.c.bf16 %v1542_v21, %v1544_v23  ;;  %v1546_v31 = vpop.eup %1545 }
 0x69e   : > { %1555 = vpow2.f32 %v972_v24  ;;  %979 = vadd.xlane.f32.xlu0 %v978_v29  ;;  %1464 = vmatprep.subr.bf16.mxu0 %v1009_v28  ;;  %v984_v33 = vsel %vm929_vm4, %v1546_v31, 0.0  ;;  %v1013_v36 = vpop.permute.xlu1 %1012  ;;  %v1331_v29 = vld [vmem:[%s1874_s7] ss:$0 sm:$0xff] }
 0x69f   : > { %1465 = vmatpush3.bf16.msra.mxu0 %v1009_v28  ;;  %1470 = vmatprep.mubr.msk.bf16.mxu0 %vm929_vm4, %v1002_v30 }
 0x6a0   : > { %v1548_v32 = vpop.eup %1547  ;;  %1466 = vmatprep.subr.bf16.mxu0 %v1011_v27 }
 0x6a1   : > { %v1003_v34 = vpack.c.bf16 %v1548_v32, %v1546_v31  ;;  %v1550_v35 = vpop.eup %1549  ;;  %v987_v6 = vsel %vm929_vm4, %v1548_v32, 0.0 }
 0x6a2   : > { %985 = vadd.xlane.f32.xlu0 %v984_v33  ;;  %v996_v38 = vsel %vm929_vm4, %v1550_v35, 0.0 }
 0x6a3   : > { %1467 = vmatpush3.bf16.msra.mxu0 %v1011_v27 }
 0x6a4   : > { %v1552_v37 = vpop.eup %1551  ;;  %1468 = vmatprep.subr.bf16.mxu0 %v1013_v36 }
 0x6a5   : > { %v1554_v4 = vpop.eup %1553  ;;  %v990_v3 = vsel %vm929_vm4, %v1552_v37, 0.0 }
 0x6a6   : > { %991 = vadd.xlane.f32.xlu1 %v990_v3  ;;  %988 = vadd.xlane.f32.xlu0 %v987_v6  ;;  %v1005_v7 = vpack.c.bf16 %v1554_v4, %v1550_v35  ;;  %v999_v41 = vsel %vm929_vm4, %v1554_v4, 0.0 }
 0x6a7   : > { %1469 = vmatpush3.bf16.msra.mxu0 %v1013_v36 }
 0x6a8   : > { %v1556_v8 = vpop.eup %1555  ;;  %1478 = vmatprep.subr.bf16.mxu0 %v1537_v44 }
 0x6a9   : > { %v993_v39 = vsel %vm929_vm4, %v1556_v8, 0.0  ;;  %v1004_v40 = vpack.c.bf16 %v1556_v8, %v1552_v37 }
 0x6aa   : > { %997 = vadd.xlane.f32.xlu1 %v996_v38  ;;  %994 = vadd.xlane.f32.xlu0 %v993_v39 }
 0x6ab   : > { %1471 = vmatmul.mubr.msk.bf16.vlgmr.msra.gmra.mrb[8].mxu0 %vm929_vm4, %v1003_v34 }
 0x6ac   : > { %1474 = vmatprep.mubr.msk.bf16.mxu0 %vm929_vm4, %v1004_v40  ;;  %1479 = vmatpush3.bf16.msra.mxu0 %v1537_v44 }
 0x6ad   : > { %1480 = vmatprep.subr.bf16.mxu0 %v1538_v45 }
 0x6ae   : > { %1000 = vadd.xlane.f32.xlu0 %v999_v41 }
 0x6b0   : > { %1481 = vmatpush3.bf16.msra.mxu0 %v1538_v45 }
 0x6b3   : > { %1475 = vmatmul.mubr.msk.bf16.gmra.mrb[12].mxu0 %vm929_vm4, %v1005_v7 }
 0x72a   : > { %v983_v54 = vpop.xlane.xlu1 %982 }
 0x72b   : > { %v980_v46 = vpop.xlane.xlu0 %979  ;;  %1557 = vrcp.f32 %v983_v54 }
 0x72f   : > { %v986_v52 = vpop.xlane.xlu0 %985 }
 0x730   : > { %1559 = vrcp.f32 %v986_v52 }
 0x733   : > { %v989_v53 = vpop.xlane.xlu0 %988  ;;  %v992_v56 = vpop.xlane.xlu1 %991 }
 0x734   : > { %1561 = vrcp.f32 %v989_v53 }
 0x735   : > { %1563 = vrcp.f32 %v980_v46  ;;  %v1558_v61 = vpop.eup %1557 }
 0x736   : > { %1565 = vrcp.f32 %v992_v56 }
 0x737   : > { %v995_v57 = vpop.xlane.xlu0 %994  ;;  %v998_v58 = vpop.xlane.xlu1 %997 }
 0x738   : > { %1567 = vrcp.f32 %v998_v58 }
 0x73a   : > { %v1560_v63 = vpop.eup %1559 }
 0x73b   : > { %v1001_v59 = vpop.xlane.xlu0 %1000 }
 0x73c   : > { %1569 = vrcp.f32 %v1001_v59 }
 0x73d   : > { %1571 = vrcp.f32 %v995_v57 }
 0x73e   : > { %v1562_v43 = vpop.eup %1561 }
 0x73f   : > { %v1564_v47 = vpop.eup %1563 }
 0x740   : > { %v1566_v2 = vpop.eup %1565 }
 0x742   : > { %v1568_v13 = vpop.eup %1567 }
 0x746   : > { %v1570_v15 = vpop.eup %1569 }
 0x747   : > { %v1572_v18 = vpop.eup %1571 }
 0x77e   : > { %v1472_v62 = vpop.f32.mrb[8].mxu0 }
 0x77f   : > { %v1064_v42 = vpop.f32.mrb[9].mxu0  ;;  %v1105_v48 = vmul.f32 %v1560_v63, %v1472_v62 }
 0x780   : > { %v1473_v1 = vpop.f32.mrb[10].mxu0  ;;  %v1103_v51 = vmul.f32 %v1564_v47, %v1064_v42 }
 0x781   : > { %v1106_v49 = vmul.f32 %v1562_v43, %v1473_v1  ;;  %v1067_v50 = vpop.f32.mrb[11].mxu0 }
 0x782   : > { %v1104_v55 = vmul.f32 %v1558_v61, %v1067_v50 }
 0x783   : > { %v1112_v60 = vpack.c.bf16 %v1106_v49, %v1105_v48 }
 0x784   : > { %v1111_v0 = vpack.c.bf16 %v1104_v55, %v1103_v51 }
 0x786   : > { %v1476_v5 = vpop.f32.mrb[12].mxu0  ;;  %1482 = vmatprep.mubr.msk.bf16.mxu0 %vm319_vm3, %v1111_v0 }
 0x787   : > { %v1080_v14 = vpop.f32.mrb[13].mxu0  ;;  %1483 = vmatmul.mubr.msk.bf16.vlgmr.msra.gmra.mrb[16].mxu0 %vm319_vm3, %v1112_v60  ;;  %v1109_v20 = vmul.f32 %v1568_v13, %v1476_v5 }
 0x788   : > { %v1477_v17 = vpop.f32.mrb[14].mxu0  ;;  %v1107_v24 = vmul.f32 %v1566_v2, %v1080_v14 }
 0x789   : > { %v1110_v21 = vmul.f32 %v1570_v15, %v1477_v17  ;;  %v1083_v23 = vpop.f32.mrb[15].mxu0 }
 0x78a   : > { %v1108_v26 = vmul.f32 %v1572_v18, %v1083_v23 }
 0x78b   : > { %v1114_v27 = vpack.c.bf16 %v1110_v21, %v1109_v20 }
 0x78c   : > { %v1113_v28 = vpack.c.bf16 %v1108_v26, %v1107_v24 }
 0x78e   : > { %1486 = vmatprep.mubr.msk.bf16.mxu0 %vm319_vm3, %v1113_v28 }
 0x78f   : > { %1487 = vmatmul.mubr.msk.bf16.gmra.mrb[20].mxu0 %vm319_vm3, %v1114_v27 }
 0x85a   : > { %v1484_v30 = vpop.f32.mrb[16].mxu0 }
 0x85b   : > { %v1193_v31 = vadd.f32 %v1484_v30, %v1331_v29  ;;  %v1184_v32 = vpop.f32.mrb[17].mxu0 }
 0x85c   : > { %v1185_v33 = vadd.f32 %v1331_v29, %v1184_v32  ;;  %v1485_v34 = vpop.f32.mrb[18].mxu0 }
 0x85d   : > { %v1217_v35 = vadd.f32 %v1193_v31, %v1686_v11  ;;  %v1196_v36 = vadd.f32 %v1485_v34, %v1331_v29  ;;  %v1187_v37 = vpop.f32.mrb[19].mxu0 }
 0x85e   : > { %v1215_v4 = vadd.f32 %v1185_v33, %v1682_v9  ;;  %v1188_v3 = vadd.f32 %v1331_v29, %v1187_v37 }
 0x85f   : > { %v1225_v6 = vmul.f32 0.70710677, %v1217_v35  ;;  %v1218_v7 = vadd.f32 %v1196_v36, %v1688_v12 }
 0x860   : > { %v1223_v8 = vmul.f32 0.70710677, %v1215_v4  ;;  %v1216_v11 = vadd.f32 %v1188_v3, %v1684_v10 }
 0x861   : > { %1233 = vst.msk [vmem:[%s1839_s20 + $0x10] sm:$0xff] %vm319_vm3, %v1225_v6  ;;  %v1226_v38 = vmul.f32 0.70710677, %v1218_v7 }
 0x862   : > { %1231 = vst.msk [vmem:[%s1839_s20] sm:$0xff] %vm319_vm3, %v1223_v8  ;;  %v1224_v39 = vmul.f32 0.70710677, %v1216_v11  ;;  %v1488_v40 = vpop.f32.mrb[20].mxu0 }
 0x863   : > { %1234 = vst.msk [vmem:[%s1839_s20 + $0x18] sm:$0xff] %vm319_vm3, %v1226_v38  ;;  %v1209_v41 = vadd.f32 %v1488_v40, %v1331_v29  ;;  %v1200_v9 = vpop.f32.mrb[21].mxu0 }
 0x864   : > { %1232 = vst.msk [vmem:[%s1839_s20 + $0x8] sm:$0xff] %vm319_vm3, %v1224_v39  ;;  %v1201_v12 = vadd.f32 %v1331_v29, %v1200_v9  ;;  %v1489_v44 = vpop.f32.mrb[22].mxu0 }
 0x865   : > { %v1221_v10 = vadd.f32 %v1209_v41, %v1708_v22  ;;  %v1212_v45 = vadd.f32 %v1489_v44, %v1331_v29  ;;  %v1203_v46 = vpop.f32.mrb[23].mxu0 }
 0x866   : > { %v1219_v52 = vadd.f32 %v1201_v12, %v1697_v16  ;;  %v1204_v53 = vadd.f32 %v1331_v29, %v1203_v46 }
 0x867   : > { %v1229_v54 = vmul.f32 0.70710677, %v1221_v10  ;;  %v1222_v56 = vadd.f32 %v1212_v45, %v1712_v25 }
 0x868   : > { %v1227_v57 = vmul.f32 0.70710677, %v1219_v52  ;;  %v1220_v58 = vadd.f32 %v1204_v53, %v1701_v19 }
 0x869   : > { %1237 = vst.msk [vmem:[%s1839_s20 + $0x30] sm:$0xff] %vm319_vm3, %v1229_v54  ;;  %v1230_v59 = vmul.f32 0.70710677, %v1222_v56 }
 0x86a   : > { %1235 = vst.msk [vmem:[%s1839_s20 + $0x20] sm:$0xff] %vm319_vm3, %v1227_v57  ;;  %v1228_v61 = vmul.f32 0.70710677, %v1220_v58 }
 0x86b   : > { %1238 = vst.msk [vmem:[%s1839_s20 + $0x38] sm:$0xff] %vm319_vm3, %v1230_v59 }
 0x86c   : > { %1236 = vst.msk [vmem:[%s1839_s20 + $0x28] sm:$0xff] %vm319_vm3, %v1228_v61 }
 0x86d PF: > { %s18_s27 = sadd.s32 1, %s1579_s27  }
 0x86e   : > { %p15_p4 = scmp.ge.s32.totalorder %s18_s27, 4  }
 0x870   :  { %17 = sbr.rel (!%p15_p4) target bundleno = 1 (0x1), region = 82 }

</bundles_post_ra>
